<compile_context>
chip_gen: v7x
topology: tpu7x:2x2x1
jax: 0.10.0
libtpu: 0.0.40
codegen_flags: <defaults>
</compile_context>

<pallas_src>
import numpy as np
import jax
import jax.numpy as jnp
from jax.experimental import pallas as pl
from jax.experimental.pallas import tpu as pltpu

BICUBIC_K = np.array(
    [[0.0001373291015625, 0.0004119873046875, -0.0013275146484375, -0.0050811767578125,
      -0.0050811767578125, -0.0013275146484375, 0.0004119873046875, 0.0001373291015625],
     [0.0004119873046875, 0.0012359619140625, -0.0039825439453125, -0.0152435302734375,
      -0.0152435302734375, -0.0039825439453125, 0.0012359619140625, 0.0004119873046875],
     [-0.0013275146484375, -0.003982543945313, 0.0128326416015625, 0.0491180419921875,
      0.0491180419921875, 0.0128326416015625, -0.0039825439453125, -0.0013275146484375],
     [-0.0050811767578125, -0.0152435302734375, 0.0491180419921875, 0.188003540039063,
      0.188003540039063, 0.0491180419921875, -0.0152435302734375, -0.0050811767578125],
     [-0.0050811767578125, -0.0152435302734375, 0.0491180419921875, 0.188003540039063,
      0.188003540039063, 0.0491180419921875, -0.0152435302734375, -0.0050811767578125],
     [-0.001327514648438, -0.0039825439453125, 0.0128326416015625, 0.0491180419921875,
      0.0491180419921875, 0.0128326416015625, -0.0039825439453125, -0.0013275146484375],
     [0.0004119873046875, 0.0012359619140625, -0.0039825439453125, -0.0152435302734375,
      -0.0152435302734375, -0.0039825439453125, 0.0012359619140625, 0.0004119873046875],
     [0.0001373291015625, 0.0004119873046875, -0.0013275146484375, -0.0050811767578125,
      -0.0050811767578125, -0.0013275146484375, 0.0004119873046875, 0.0001373291015625]],
    dtype=np.float64)
KSIZE = 8


def _separable_taps():
    """Recover the 1D taps whose outer product is BICUBIC_K (exact to ~1e-16)."""
    U, S, Vt = np.linalg.svd(BICUBIC_K)
    k_row = U[:, 0] * np.sqrt(S[0])   # applied along H
    k_col = Vt[0, :] * np.sqrt(S[0])  # applied along W
    return k_row, k_col


def _sampling_matrix(rows_out, cols_in, offset, stride, pad, taps):
    """A[r, c] so that (A @ x) reproduces the zero-padded strided 1D conv + shave."""
    A = np.zeros((rows_out, cols_in), np.float32)
    for r in range(rows_out):
        base = (r + offset) * stride - pad
        for i in range(KSIZE):
            c = base + i
            if 0 <= c < cols_in:
                A[r, c] += taps[i]
    return A


def downscale_loss_pallas(g_input, g_output, scale_factor):
    """Pallas implementation of DownScaleLoss.forward (returns a scalar f32)."""
    N, C, H, W = g_input.shape
    No, Co, h, w = g_output.shape
    assert (N, C) == (No, Co)

    stride = round(1.0 / scale_factor)            # PyTorch: round(1 / sf)
    pad = (KSIZE - 1) // 2                        # 3
    Ho = (H + 2 * pad - KSIZE) // stride + 1
    Wo = (W + 2 * pad - KSIZE) // stride + 1

    # shave_a2b offsets (static)
    shave_r, shave_c = max(0, Ho - h), max(0, Wo - w)
    sr, sc = shave_r // 2, shave_c // 2
    assert Ho - shave_r == h and Wo - shave_c == w, "g_output larger than downscaled"

    # Separable 1D taps -> row/col sampling matrices (fold stride, zero padding
    # and the symmetric shave), so D[nc] = Ah @ X[nc] @ AwT.
    k_row, k_col = _separable_taps()
    Ah = jnp.asarray(_sampling_matrix(h, H, sr, stride, pad, k_row))        # (h, H)
    AwT = jnp.asarray(_sampling_matrix(w, W, sc, stride, pad, k_col).T)     # (W, w)

    NC = N * C
    x = g_input.reshape(NC, H, W).astype(jnp.float32)     # free reshape (leading dims)
    go = g_output.reshape(NC, h, w).astype(jnp.float32)

    # NC tile size: amortize per-grid-step overhead but keep the double-buffered
    # input tiles well inside scoped VMEM on every generation (incl. v7x 64 MiB).
    per_nc_bytes = 4 * (H * W + h * w)
    budget_bytes = 8 * 1024 * 1024
    bnc = max(1, min(8, NC, budget_bytes // max(per_nc_bytes, 1)))
    nc_pad = -(-NC // bnc) * bnc
    if nc_pad != NC:
        # zero-padded (n,c) slices contribute exactly 0 to the sum of squares
        x = jnp.pad(x, ((0, nc_pad - NC), (0, 0), (0, 0)))
        go = jnp.pad(go, ((0, nc_pad - NC), (0, 0), (0, 0)))
    grid = nc_pad // bnc

    inv_count = 1.0 / float(NC * h * w)

    def kernel(x_ref, go_ref, ah_ref, awt_ref, o_ref):
        ah = ah_ref[...]                                   # (h, H)  resident constant
        awt = awt_ref[...]                                 # (W, w)  resident constant
        sq = jnp.zeros((h, w), jnp.float32)
        for b in range(bnc):                               # static unroll over the tile
            # separable downscale as two MXU matmuls
            t = jnp.dot(x_ref[b], awt, preferred_element_type=jnp.float32)   # (H, w)
            d = jnp.dot(ah, t, preferred_element_type=jnp.float32)           # (h, w)
            diff = go_ref[b] - d
            sq = sq + diff * diff
        s = jnp.sum(sq)
        # lane-dense partial-sum block: every element written, value at [0,0,0]
        row = jax.lax.broadcasted_iota(jnp.int32, (1, 8, 128), 1)
        col = jax.lax.broadcasted_iota(jnp.int32, (1, 8, 128), 2)
        o_ref[...] = jnp.where((row == 0) & (col == 0), s, 0.0)

    partials = pl.pallas_call(
        kernel,
        out_shape=jax.ShapeDtypeStruct((grid, 8, 128), jnp.float32),
        grid_spec=pltpu.PrefetchScalarGridSpec(
            num_scalar_prefetch=0,
            grid=(grid,),
            in_specs=[
                pl.BlockSpec((bnc, H, W), lambda i: (i, 0, 0)),   # image tile (pipelined)
                pl.BlockSpec((bnc, h, w), lambda i: (i, 0, 0)),   # g_output tile
                pl.BlockSpec((h, H), lambda i: (0, 0)),           # Ah (resident)
                pl.BlockSpec((W, w), lambda i: (0, 0)),           # AwT (resident)
            ],
            out_specs=pl.BlockSpec((1, 8, 128), lambda i: (i, 0, 0)),
        ),
        compiler_params=pltpu.CompilerParams(
            dimension_semantics=("parallel",),        # megacore-shardable on v7x
            vmem_limit_bytes=32 * 1024 * 1024,
        ),
    )(x, go, Ah, AwT)

    return jnp.sum(partials) * inv_count


def downscale_loss_ref(g_input, g_output, scale_factor):
    """Pure-JAX reference (lax depthwise conv with the literal 2D kernel)."""
    stride = round(1.0 / scale_factor)
    C = g_input.shape[1]
    pad = (KSIZE - 1) // 2
    kern = jnp.tile(jnp.asarray(BICUBIC_K, dtype=jnp.float32)[None, None], (C, 1, 1, 1))
    down = jax.lax.conv_general_dilated(
        g_input.astype(jnp.float32), kern,
        window_strides=(stride, stride), padding=((pad, pad), (pad, pad)),
        feature_group_count=C, dimension_numbers=("NCHW", "OIHW", "NCHW"))
    Ho, Wo = down.shape[2], down.shape[3]
    h, w = g_output.shape[2], g_output.shape[3]
    sr, sc = max(0, Ho - h) // 2, max(0, Wo - w) // 2
    shaved = down[:, :, sr:sr + h, sc:sc + w]
    diff = g_output.astype(jnp.float32) - shaved
    return jnp.mean(diff * diff)


if __name__ == "__main__":
    key = jax.random.PRNGKey(0)
    k1, k2 = jax.random.split(key)
    scale_factor = 0.5                       # stride = 2
    g_input = jax.random.normal(k1, (2, 4, 16, 16), dtype=jnp.float32)   # NCHW
    # downscaled conv output is 8x8; use 6x6 g_output to exercise shave_a2b
    g_output = jax.random.normal(k2, (2, 4, 6, 6), dtype=jnp.float32)

    loss = jax.jit(downscale_loss_pallas, static_argnums=2)(g_input, g_output, scale_factor)
    loss = jax.block_until_ready(loss)

    ref = jax.block_until_ready(downscale_loss_ref(g_input, g_output, scale_factor))
    np.testing.assert_allclose(np.asarray(loss), np.asarray(ref), rtol=1e-5, atol=1e-6)

    print("KERNEL_OK")
</pallas_src>

<mosaic_0001>
module attributes {stable_mosaic.version = 11 : i64} {
  func.func @kernel(%arg0: i32, %arg1: memref<8x16x16xf32, #tpu.memory_space<vmem>>, %arg2: memref<8x6x6xf32, #tpu.memory_space<vmem>>, %arg3: memref<6x16xf32, #tpu.memory_space<vmem>>, %arg4: memref<16x6xf32, #tpu.memory_space<vmem>>, %arg5: memref<1x8x128xf32, #tpu.memory_space<vmem>>) attributes {dimension_semantics = [#tpu.dimension_semantics<parallel>], iteration_bounds = array<i64: 1>, scalar_prefetch = 0 : i64, scratch_operands = 0 : i64, tpu.core_type = #tpu.core_type<tc>, window_params = [{transform_indices = @transform_0, window_bounds = array<i64: 8, 16, 16>}, {transform_indices = @transform_1, window_bounds = array<i64: 8, 6, 6>}, {pipeline_mode = #tpu.pipeline_mode<synchronous>, transform_indices = @transform_2, window_bounds = array<i64: 6, 16>}, {pipeline_mode = #tpu.pipeline_mode<synchronous>, transform_indices = @transform_3, window_bounds = array<i64: 16, 6>}, {transform_indices = @transform_4, window_bounds = array<i64: 1, 8, 128>}]} {
    %c0 = arith.constant 0 : index
    %c0_0 = arith.constant 0 : index
    %0 = vector.load %arg3[%c0, %c0_0] : memref<6x16xf32, #tpu.memory_space<vmem>>, vector<6x16xf32>
    %c0_1 = arith.constant 0 : index
    %c0_2 = arith.constant 0 : index
    %1 = vector.load %arg4[%c0_1, %c0_2] : memref<16x6xf32, #tpu.memory_space<vmem>>, vector<16x6xf32>
    %cst = arith.constant 0.000000e+00 : f32
    %2 = vector.broadcast %cst : f32 to vector<6x6xf32>
    %c0_3 = arith.constant 0 : index
    %c0_4 = arith.constant 0 : index
    %c0_5 = arith.constant 0 : index
    %3 = vector.load %arg1[%c0_3, %c0_4, %c0_5] : memref<8x16x16xf32, #tpu.memory_space<vmem>>, vector<1x16x16xf32>
    %4 = vector.shape_cast %3 : vector<1x16x16xf32> to vector<16x16xf32>
    %cst_6 = arith.constant dense<0.000000e+00> : vector<16x6xf32>
    %5 = tpu.matmul %4, %1, %cst_6 {dimension_numbers = #tpu.dot_dimension_numbers<[1], [0], [0], [1], [0, 0, 1, 1], [], []>} : vector<16x16xf32>, vector<16x6xf32>, vector<16x6xf32> -> vector<16x6xf32>
    %cst_7 = arith.constant dense<0.000000e+00> : vector<6x6xf32>
    %6 = tpu.matmul %0, %5, %cst_7 {dimension_numbers = #tpu.dot_dimension_numbers<[1], [0], [0], [1], [0, 0, 1, 1], [], []>} : vector<6x16xf32>, vector<16x6xf32>, vector<6x6xf32> -> vector<6x6xf32>
    %c0_8 = arith.constant 0 : index
    %c0_9 = arith.constant 0 : index
    %c0_10 = arith.constant 0 : index
    %7 = vector.load %arg2[%c0_8, %c0_9, %c0_10] : memref<8x6x6xf32, #tpu.memory_space<vmem>>, vector<1x6x6xf32>
    %8 = vector.shape_cast %7 : vector<1x6x6xf32> to vector<6x6xf32>
    %9 = arith.subf %8, %6 : vector<6x6xf32>
    %10 = arith.mulf %9, %9 : vector<6x6xf32>
    %11 = arith.addf %2, %10 : vector<6x6xf32>
    %c1 = arith.constant 1 : index
    %c0_11 = arith.constant 0 : index
    %c0_12 = arith.constant 0 : index
    %12 = vector.load %arg1[%c1, %c0_11, %c0_12] : memref<8x16x16xf32, #tpu.memory_space<vmem>>, vector<1x16x16xf32>
    %13 = vector.shape_cast %12 : vector<1x16x16xf32> to vector<16x16xf32>
    %cst_13 = arith.constant dense<0.000000e+00> : vector<16x6xf32>
    %14 = tpu.matmul %13, %1, %cst_13 {dimension_numbers = #tpu.dot_dimension_numbers<[1], [0], [0], [1], [0, 0, 1, 1], [], []>} : vector<16x16xf32>, vector<16x6xf32>, vector<16x6xf32> -> vector<16x6xf32>
    %cst_14 = arith.constant dense<0.000000e+00> : vector<6x6xf32>
    %15 = tpu.matmul %0, %14, %cst_14 {dimension_numbers = #tpu.dot_dimension_numbers<[1], [0], [0], [1], [0, 0, 1, 1], [], []>} : vector<6x16xf32>, vector<16x6xf32>, vector<6x6xf32> -> vector<6x6xf32>
    %c1_15 = arith.constant 1 : index
    %c0_16 = arith.constant 0 : index
    %c0_17 = arith.constant 0 : index
    %16 = vector.load %arg2[%c1_15, %c0_16, %c0_17] : memref<8x6x6xf32, #tpu.memory_space<vmem>>, vector<1x6x6xf32>
    %17 = vector.shape_cast %16 : vector<1x6x6xf32> to vector<6x6xf32>
    %18 = arith.subf %17, %15 : vector<6x6xf32>
    %19 = arith.mulf %18, %18 : vector<6x6xf32>
    %20 = arith.addf %11, %19 : vector<6x6xf32>
    %c2 = arith.constant 2 : index
    %c0_18 = arith.constant 0 : index
    %c0_19 = arith.constant 0 : index
    %21 = vector.load %arg1[%c2, %c0_18, %c0_19] : memref<8x16x16xf32, #tpu.memory_space<vmem>>, vector<1x16x16xf32>
    %22 = vector.shape_cast %21 : vector<1x16x16xf32> to vector<16x16xf32>
    %cst_20 = arith.constant dense<0.000000e+00> : vector<16x6xf32>
    %23 = tpu.matmul %22, %1, %cst_20 {dimension_numbers = #tpu.dot_dimension_numbers<[1], [0], [0], [1], [0, 0, 1, 1], [], []>} : vector<16x16xf32>, vector<16x6xf32>, vector<16x6xf32> -> vector<16x6xf32>
    %cst_21 = arith.constant dense<0.000000e+00> : vector<6x6xf32>
    %24 = tpu.matmul %0, %23, %cst_21 {dimension_numbers = #tpu.dot_dimension_numbers<[1], [0], [0], [1], [0, 0, 1, 1], [], []>} : vector<6x16xf32>, vector<16x6xf32>, vector<6x6xf32> -> vector<6x6xf32>
    %c2_22 = arith.constant 2 : index
    %c0_23 = arith.constant 0 : index
    %c0_24 = arith.constant 0 : index
    %25 = vector.load %arg2[%c2_22, %c0_23, %c0_24] : memref<8x6x6xf32, #tpu.memory_space<vmem>>, vector<1x6x6xf32>
    %26 = vector.shape_cast %25 : vector<1x6x6xf32> to vector<6x6xf32>
    %27 = arith.subf %26, %24 : vector<6x6xf32>
    %28 = arith.mulf %27, %27 : vector<6x6xf32>
    %29 = arith.addf %20, %28 : vector<6x6xf32>
    %c3 = arith.constant 3 : index
    %c0_25 = arith.constant 0 : index
    %c0_26 = arith.constant 0 : index
    %30 = vector.load %arg1[%c3, %c0_25, %c0_26] : memref<8x16x16xf32, #tpu.memory_space<vmem>>, vector<1x16x16xf32>
    %31 = vector.shape_cast %30 : vector<1x16x16xf32> to vector<16x16xf32>
    %cst_27 = arith.constant dense<0.000000e+00> : vector<16x6xf32>
    %32 = tpu.matmul %31, %1, %cst_27 {dimension_numbers = #tpu.dot_dimension_numbers<[1], [0], [0], [1], [0, 0, 1, 1], [], []>} : vector<16x16xf32>, vector<16x6xf32>, vector<16x6xf32> -> vector<16x6xf32>
    %cst_28 = arith.constant dense<0.000000e+00> : vector<6x6xf32>
    %33 = tpu.matmul %0, %32, %cst_28 {dimension_numbers = #tpu.dot_dimension_numbers<[1], [0], [0], [1], [0, 0, 1, 1], [], []>} : vector<6x16xf32>, vector<16x6xf32>, vector<6x6xf32> -> vector<6x6xf32>
    %c3_29 = arith.constant 3 : index
    %c0_30 = arith.constant 0 : index
    %c0_31 = arith.constant 0 : index
    %34 = vector.load %arg2[%c3_29, %c0_30, %c0_31] : memref<8x6x6xf32, #tpu.memory_space<vmem>>, vector<1x6x6xf32>
    %35 = vector.shape_cast %34 : vector<1x6x6xf32> to vector<6x6xf32>
    %36 = arith.subf %35, %33 : vector<6x6xf32>
    %37 = arith.mulf %36, %36 : vector<6x6xf32>
    %38 = arith.addf %29, %37 : vector<6x6xf32>
    %c4 = arith.constant 4 : index
    %c0_32 = arith.constant 0 : index
    %c0_33 = arith.constant 0 : index
    %39 = vector.load %arg1[%c4, %c0_32, %c0_33] : memref<8x16x16xf32, #tpu.memory_space<vmem>>, vector<1x16x16xf32>
    %40 = vector.shape_cast %39 : vector<1x16x16xf32> to vector<16x16xf32>
    %cst_34 = arith.constant dense<0.000000e+00> : vector<16x6xf32>
    %41 = tpu.matmul %40, %1, %cst_34 {dimension_numbers = #tpu.dot_dimension_numbers<[1], [0], [0], [1], [0, 0, 1, 1], [], []>} : vector<16x16xf32>, vector<16x6xf32>, vector<16x6xf32> -> vector<16x6xf32>
    %cst_35 = arith.constant dense<0.000000e+00> : vector<6x6xf32>
    %42 = tpu.matmul %0, %41, %cst_35 {dimension_numbers = #tpu.dot_dimension_numbers<[1], [0], [0], [1], [0, 0, 1, 1], [], []>} : vector<6x16xf32>, vector<16x6xf32>, vector<6x6xf32> -> vector<6x6xf32>
    %c4_36 = arith.constant 4 : index
    %c0_37 = arith.constant 0 : index
    %c0_38 = arith.constant 0 : index
    %43 = vector.load %arg2[%c4_36, %c0_37, %c0_38] : memref<8x6x6xf32, #tpu.memory_space<vmem>>, vector<1x6x6xf32>
    %44 = vector.shape_cast %43 : vector<1x6x6xf32> to vector<6x6xf32>
    %45 = arith.subf %44, %42 : vector<6x6xf32>
    %46 = arith.mulf %45, %45 : vector<6x6xf32>
    %47 = arith.addf %38, %46 : vector<6x6xf32>
    %c5 = arith.constant 5 : index
    %c0_39 = arith.constant 0 : index
    %c0_40 = arith.constant 0 : index
    %48 = vector.load %arg1[%c5, %c0_39, %c0_40] : memref<8x16x16xf32, #tpu.memory_space<vmem>>, vector<1x16x16xf32>
    %49 = vector.shape_cast %48 : vector<1x16x16xf32> to vector<16x16xf32>
    %cst_41 = arith.constant dense<0.000000e+00> : vector<16x6xf32>
    %50 = tpu.matmul %49, %1, %cst_41 {dimension_numbers = #tpu.dot_dimension_numbers<[1], [0], [0], [1], [0, 0, 1, 1], [], []>} : vector<16x16xf32>, vector<16x6xf32>, vector<16x6xf32> -> vector<16x6xf32>
    %cst_42 = arith.constant dense<0.000000e+00> : vector<6x6xf32>
    %51 = tpu.matmul %0, %50, %cst_42 {dimension_numbers = #tpu.dot_dimension_numbers<[1], [0], [0], [1], [0, 0, 1, 1], [], []>} : vector<6x16xf32>, vector<16x6xf32>, vector<6x6xf32> -> vector<6x6xf32>
    %c5_43 = arith.constant 5 : index
    %c0_44 = arith.constant 0 : index
    %c0_45 = arith.constant 0 : index
    %52 = vector.load %arg2[%c5_43, %c0_44, %c0_45] : memref<8x6x6xf32, #tpu.memory_space<vmem>>, vector<1x6x6xf32>
    %53 = vector.shape_cast %52 : vector<1x6x6xf32> to vector<6x6xf32>
    %54 = arith.subf %53, %51 : vector<6x6xf32>
    %55 = arith.mulf %54, %54 : vector<6x6xf32>
    %56 = arith.addf %47, %55 : vector<6x6xf32>
    %c6 = arith.constant 6 : index
    %c0_46 = arith.constant 0 : index
    %c0_47 = arith.constant 0 : index
    %57 = vector.load %arg1[%c6, %c0_46, %c0_47] : memref<8x16x16xf32, #tpu.memory_space<vmem>>, vector<1x16x16xf32>
    %58 = vector.shape_cast %57 : vector<1x16x16xf32> to vector<16x16xf32>
    %cst_48 = arith.constant dense<0.000000e+00> : vector<16x6xf32>
    %59 = tpu.matmul %58, %1, %cst_48 {dimension_numbers = #tpu.dot_dimension_numbers<[1], [0], [0], [1], [0, 0, 1, 1], [], []>} : vector<16x16xf32>, vector<16x6xf32>, vector<16x6xf32> -> vector<16x6xf32>
    %cst_49 = arith.constant dense<0.000000e+00> : vector<6x6xf32>
    %60 = tpu.matmul %0, %59, %cst_49 {dimension_numbers = #tpu.dot_dimension_numbers<[1], [0], [0], [1], [0, 0, 1, 1], [], []>} : vector<6x16xf32>, vector<16x6xf32>, vector<6x6xf32> -> vector<6x6xf32>
    %c6_50 = arith.constant 6 : index
    %c0_51 = arith.constant 0 : index
    %c0_52 = arith.constant 0 : index
    %61 = vector.load %arg2[%c6_50, %c0_51, %c0_52] : memref<8x6x6xf32, #tpu.memory_space<vmem>>, vector<1x6x6xf32>
    %62 = vector.shape_cast %61 : vector<1x6x6xf32> to vector<6x6xf32>
    %63 = arith.subf %62, %60 : vector<6x6xf32>
    %64 = arith.mulf %63, %63 : vector<6x6xf32>
    %65 = arith.addf %56, %64 : vector<6x6xf32>
    %c7 = arith.constant 7 : index
    %c0_53 = arith.constant 0 : index
    %c0_54 = arith.constant 0 : index
    %66 = vector.load %arg1[%c7, %c0_53, %c0_54] : memref<8x16x16xf32, #tpu.memory_space<vmem>>, vector<1x16x16xf32>
    %67 = vector.shape_cast %66 : vector<1x16x16xf32> to vector<16x16xf32>
    %cst_55 = arith.constant dense<0.000000e+00> : vector<16x6xf32>
    %68 = tpu.matmul %67, %1, %cst_55 {dimension_numbers = #tpu.dot_dimension_numbers<[1], [0], [0], [1], [0, 0, 1, 1], [], []>} : vector<16x16xf32>, vector<16x6xf32>, vector<16x6xf32> -> vector<16x6xf32>
    %cst_56 = arith.constant dense<0.000000e+00> : vector<6x6xf32>
    %69 = tpu.matmul %0, %68, %cst_56 {dimension_numbers = #tpu.dot_dimension_numbers<[1], [0], [0], [1], [0, 0, 1, 1], [], []>} : vector<6x16xf32>, vector<16x6xf32>, vector<6x6xf32> -> vector<6x6xf32>
    %c7_57 = arith.constant 7 : index
    %c0_58 = arith.constant 0 : index
    %c0_59 = arith.constant 0 : index
    %70 = vector.load %arg2[%c7_57, %c0_58, %c0_59] : memref<8x6x6xf32, #tpu.memory_space<vmem>>, vector<1x6x6xf32>
    %71 = vector.shape_cast %70 : vector<1x6x6xf32> to vector<6x6xf32>
    %72 = arith.subf %71, %69 : vector<6x6xf32>
    %73 = arith.mulf %72, %72 : vector<6x6xf32>
    %74 = arith.addf %65, %73 : vector<6x6xf32>
    %75 = vector.shape_cast %74 : vector<6x6xf32> to vector<1x6x6xf32>
    %cst_60 = arith.constant dense<0.000000e+00> : vector<1xf32>
    %76 = vector.multi_reduction <add>, %75, %cst_60 [1, 2] : vector<1x6x6xf32> to vector<1xf32>
    %77 = vector.shape_cast %76 : vector<1xf32> to vector<1x1x1xf32>
    %78 = vector.extract %77[0, 0, 0] : f32 from vector<1x1x1xf32>
    %79 = tpu.iota {dimensions = array<i32: 1>} : vector<1x8x128xi32>
    %80 = tpu.iota {dimensions = array<i32: 2>} : vector<1x8x128xi32>
    %c0_i32 = arith.constant 0 : i32
    %81 = vector.broadcast %c0_i32 : i32 to vector<1x8x128xi32>
    %82 = arith.cmpi eq, %79, %81 : vector<1x8x128xi32>
    %c0_i32_61 = arith.constant 0 : i32
    %83 = vector.broadcast %c0_i32_61 : i32 to vector<1x8x128xi32>
    %84 = arith.cmpi eq, %80, %83 : vector<1x8x128xi32>
    %85 = arith.andi %82, %84 : vector<1x8x128xi1>
    %cst_62 = arith.constant 0.000000e+00 : f32
    %86 = vector.broadcast %78 : f32 to vector<1x8x128xf32>
    %87 = vector.broadcast %cst_62 : f32 to vector<1x8x128xf32>
    %88 = arith.select %85, %86, %87 : vector<1x8x128xi1>, vector<1x8x128xf32>
    %c0_63 = arith.constant 0 : index
    %c0_64 = arith.constant 0 : index
    %c0_65 = arith.constant 0 : index
    %89 = vector.load %arg5[%c0_63, %c0_64, %c0_65] : memref<1x8x128xf32, #tpu.memory_space<vmem>>, vector<1x8x128xf32>
    tpu.vector_store %arg5[%c0_63, %c0_64, %c0_65], %88 {strides = array<i32>} : memref<1x8x128xf32, #tpu.memory_space<vmem>>, vector<1x8x128xf32>,
    return
  }
  func.func @transform_0(%arg0: i32) -> (i32, i32, i32) {
    %c0_i32 = arith.constant 0 : i32
    %c0_i32_0 = arith.constant 0 : i32
    %c0_i32_1 = arith.constant 0 : i32
    return %arg0, %c0_i32, %c0_i32_0 : i32, i32, i32
  }
  func.func @transform_1(%arg0: i32) -> (i32, i32, i32) {
    %c0_i32 = arith.constant 0 : i32
    %c0_i32_0 = arith.constant 0 : i32
    %c0_i32_1 = arith.constant 0 : i32
    return %arg0, %c0_i32, %c0_i32_0 : i32, i32, i32
  }
  func.func @transform_2(%arg0: i32) -> (i32, i32) {
    %c0_i32 = arith.constant 0 : i32
    %c0_i32_0 = arith.constant 0 : i32
    %c0_i32_1 = arith.constant 0 : i32
    return %c0_i32, %c0_i32_0 : i32, i32
  }
  func.func @transform_3(%arg0: i32) -> (i32, i32) {
    %c0_i32 = arith.constant 0 : i32
    %c0_i32_0 = arith.constant 0 : i32
    %c0_i32_1 = arith.constant 0 : i32
    return %c0_i32, %c0_i32_0 : i32, i32
  }
  func.func @transform_4(%arg0: i32) -> (i32, i32, i32) {
    %c0_i32 = arith.constant 0 : i32
    %c0_i32_0 = arith.constant 0 : i32
    %c0_i32_1 = arith.constant 0 : i32
    return %arg0, %c0_i32, %c0_i32_0 : i32, i32, i32
  }
}

</mosaic_0001>

<bundles_post_ra>
// kernel: downscale_loss_pallas.1
= control target key start
LH: loop header
LB: loop body
LE: loop exit
PB: predicated region body
PF: predicated region fallthrough
CT: control target
= control target key end

     0   :  { %9 = vsyncpa [#allocation3], 0  ;;  %s1621_s15 = smov [#allocation2]   ;;  %s1732_s0 = inlined_call_operand.hbm [shape: f32[8,16,16], index: 0, kind: input, shape index: {}]   ;;  %s1733_s1 = inlined_call_operand.vmem [shape: f32[8,6,6], index: 1, kind: input, shape index: {}]   ;;  %s1734_s2 = inlined_call_operand.vmem [shape: f32[6,16], index: 2, kind: input, shape index: {}]   ;;  %s1735_s3 = inlined_call_operand.vmem [shape: f32[16,6], index: 3, kind: input, shape index: {}]   ;;  %s1736_s4 = inlined_call_operand.vmem [shape: f32[1,8,128], index: 4, kind: output, shape index: {}]  }
   0x1   :  { %s15_s16 = sshll.u32 %s1621_s15, 4  ;;  %s1597_s19 = scalar_lea.hbm %s1732_s0, 2048  ;;  %s16_s16 = int_to_ptr.vmem [resolvable:$true] %s15_s16 }
   0x2   :  { %p1598_p0 = scmp.ne.s32.totalorder %s1732_s0, %s1597_s19  ;;  %p1601_p1 = scmp.lt.u32.totalorder %s1597_s19, %s1732_s0 }
   0x4   :  { %p1603_p2 = pnand %p1601_p1, %p1598_p0 }
   0x6   :  { %1606 = shalt.err (!%p1603_p2)
}
   0x7   :  { %s1607_s24 = scalar_lea.vmem %s16_s16, 2048  ;;  %p1612_p4 = scmp.lt.s32.totalorder %s16_s16, %s16_s16 }
   0x8   :  { %p1608_p3 = scmp.ne.s32.totalorder %s16_s16, %s1607_s24  ;;  %p1613_p5 = scmp.lt.s32.totalorder %s1607_s24, %s1607_s24 }
   0xa   :  { %p1614_p6 = por %p1613_p5, %p1612_p4 }
   0xc   :  { %p1615_p7 = pnand %p1614_p6, %p1608_p3 }
   0xe   :  { %1618 = shalt.err (!%p1615_p7)
}
   0xf   :  { %s1622_s25 = smov 128   ;;  %s1623_s26 = smov 8  }
  0x10   :  { %21 = dma.hbm_to_vmem [thread:$0]  %s1732_s0, 2048, %s16_s16, [#allocation3], %s1622_s25, %s1622_s25, %s1623_s26  }
  0x11   :  { %1619 = dma.done.wait [#allocation3], 2048  }
  0x12   :  { %1620 = vsyncadd [#allocation3], 4294965248  ;;  %vm36_vm0 = vcmask 130048   ;;  %v32_v0 = vld [vmem:[%s1735_s3] sm:$0xff]  ;;  %v33_v1 = vld [vmem:[%s1735_s3 + $0x8] sm:$0xff]  ;;  %v1624_v19 = vmov 0.0|0.0  }
  0x13   :  { %v34_v2 = vld [vmem:[#allocation2] sm:$0xff]  ;;  %v1533_v3 = vpack.c.bf16 %v33_v1, %v32_v0  ;;  %v35_v4 = vld [vmem:[#allocation2 + $0x8] sm:$0xff]  ;;  %v196_v5 = vld [vmem:[#allocation2 + $0x10] sm:$0xff]  ;;  %1537 = vmatprep.subr.bf16.mxu1 %v1624_v19  ;;  %vm1625_vm1 = vmmov 0   ;;  %v1626_v20 = vmov 0.0   ;;  %vm1308_vm2 = vcmask 46080  }
  0x14   :  { %1425 = vmatprep.mubr.msk.f32.mxu0 %vm36_vm0, %v34_v2  ;;  %v197_v6 = vld [vmem:[#allocation2 + $0x18] sm:$0xff]  ;;  %v355_v7 = vld [vmem:[#allocation2 + $0x20] sm:$0xff]  ;;  %v356_v8 = vld [vmem:[#allocation2 + $0x28] sm:$0xff]  ;;  %1432 = vmatprep.mubr.msk.f32.mxu1 %vm1625_vm1, %v1626_v20 }
  0x15   :  { %1534 = vmatprep.subr.bf16.mxu0 %v1533_v3  ;;  %v514_v9 = vld [vmem:[#allocation2 + $0x30] sm:$0xff]  ;;  %v515_v10 = vld [vmem:[#allocation2 + $0x38] sm:$0xff]  ;;  %v673_v11 = vld [vmem:[#allocation2 + $0x40] sm:$0xff] }
  0x16   :  { %1536 = vmatpush3.bf16.msra.mxu0 %v1533_v3  ;;  %v674_v12 = vld [vmem:[#allocation2 + $0x48] sm:$0xff]  ;;  %v832_v13 = vld [vmem:[#allocation2 + $0x50] sm:$0xff]  ;;  %v833_v14 = vld [vmem:[#allocation2 + $0x58] sm:$0xff] }
  0x17   :  { %1541 = vmatprep.subr.bf16.mxu0 %v1533_v3  ;;  %v991_v15 = vld [vmem:[#allocation2 + $0x60] sm:$0xff]  ;;  %v992_v16 = vld [vmem:[#allocation2 + $0x68] sm:$0xff]  ;;  %v1150_v17 = vld [vmem:[#allocation2 + $0x70] sm:$0xff] }
  0x18   :  { %v1151_v18 = vld [vmem:[#allocation2 + $0x78] sm:$0xff]  ;;  %v31_v25 = vld [vmem:[%s1734_s2] sm:$0x3f]  ;;  %v1340_v49 = vld [vmem:[%s1733_s1 + $0x8] sm:$0x3f] }
  0x19   :  { %1426 = vmatmul.mubr.msk.f32.vlgmr.msra.gmra.mrb[0].mxu0 %vm36_vm0, %v35_v4  ;;  %v191_v47 = vld [vmem:[%s1733_s1] sm:$0x3f]  ;;  %v1344_v54 = vld [vmem:[%s1733_s1 + $0x10] sm:$0x3f]  ;;  %v1348_v61 = vld [vmem:[%s1733_s1 + $0x18] sm:$0x3f] }
  0x1a   :  { %1543 = vmatpush3.bf16.msra.mxu0 %v1533_v3  ;;  %1439 = vmatprep.mubr.msk.f32.mxu0 %vm36_vm0, %v196_v5 }
  0x1b   :  { %1548 = vmatprep.subr.bf16.mxu0 %v1533_v3 }
  0x1d   :  { %1440 = vmatmul.mubr.msk.f32.vlgmr.msra.gmra.mrb[2].mxu0 %vm36_vm0, %v197_v6 }
  0x1e   :  { %1550 = vmatpush3.bf16.msra.mxu0 %v1533_v3  ;;  %1453 = vmatprep.mubr.msk.f32.mxu0 %vm36_vm0, %v355_v7 }
  0x1f   :  { %1555 = vmatprep.subr.bf16.mxu0 %v1533_v3 }
  0x21   :  { %1454 = vmatmul.mubr.msk.f32.vlgmr.msra.gmra.mrb[4].mxu0 %vm36_vm0, %v356_v8 }
  0x22   :  { %1557 = vmatpush3.bf16.msra.mxu0 %v1533_v3  ;;  %1467 = vmatprep.mubr.msk.f32.mxu0 %vm36_vm0, %v514_v9  ;;  %v1356_v9 = vld [vmem:[%s1733_s1 + $0x28] sm:$0x3f] }
  0x23   :  { %1562 = vmatprep.subr.bf16.mxu0 %v1533_v3 }
  0x25   :  { %1468 = vmatmul.mubr.msk.f32.vlgmr.msra.gmra.mrb[6].mxu0 %vm36_vm0, %v515_v10 }
  0x26   :  { %1564 = vmatpush3.bf16.msra.mxu0 %v1533_v3  ;;  %1481 = vmatprep.mubr.msk.f32.mxu0 %vm36_vm0, %v673_v11 }
  0x27   :  { %1569 = vmatprep.subr.bf16.mxu0 %v1533_v3 }
  0x29   :  { %1482 = vmatmul.mubr.msk.f32.vlgmr.msra.gmra.mrb[8].mxu0 %vm36_vm0, %v674_v12 }
  0x2a   :  { %1571 = vmatpush3.bf16.msra.mxu0 %v1533_v3  ;;  %1495 = vmatprep.mubr.msk.f32.mxu0 %vm36_vm0, %v832_v13 }
  0x2b   :  { %1576 = vmatprep.subr.bf16.mxu0 %v1533_v3 }
  0x2d   :  { %1496 = vmatmul.mubr.msk.f32.vlgmr.msra.gmra.mrb[10].mxu0 %vm36_vm0, %v833_v14 }
  0x2e   :  { %1578 = vmatpush3.bf16.msra.mxu0 %v1533_v3  ;;  %1509 = vmatprep.mubr.msk.f32.mxu0 %vm36_vm0, %v991_v15  ;;  %v1360_v15 = vld [vmem:[%s1733_s1 + $0x30] sm:$0x3f] }
  0x2f   :  { %1583 = vmatprep.subr.bf16.mxu0 %v1533_v3 }
  0x31   :  { %1510 = vmatmul.mubr.msk.f32.vlgmr.msra.gmra.mrb[12].mxu0 %vm36_vm0, %v992_v16 }
  0x32   :  { %1585 = vmatpush3.bf16.msra.mxu0 %v1533_v3  ;;  %1523 = vmatprep.mubr.msk.f32.mxu0 %vm36_vm0, %v1150_v17  ;;  %v1352_v3 = vld [vmem:[%s1733_s1 + $0x20] sm:$0x3f] }
  0x35   :  { %1524 = vmatmul.mubr.msk.f32.vlgmr.msra.gmra.mrb[14].mxu0 %vm36_vm0, %v1151_v18 }
  0xec   :  { %v1427_v21 = vpop.f32.mrb[0].mxu0 }
  0xed   :  { %v109_v22 = vpop.f32.mrb[1].mxu0 }
  0xee   :  { %v1538_v23 = vpack.c.bf16 %v1427_v21, %v109_v22  ;;  %v1364_v21 = vld [vmem:[%s1733_s1 + $0x38] sm:$0x3f] }
  0xf0   :  { %1539 = vmatpush3.bf16.msra.mxu1 %v1538_v23  ;;  %v1441_v24 = vpop.f32.mrb[2].mxu0 }
  0xf1   :  { %v270_v26 = vpop.f32.mrb[3].mxu0  ;;  %1544 = vmatprep.subr.bf16.mxu1 %v1624_v19 }
  0xf2   :  { %v1545_v27 = vpack.c.bf16 %v1441_v24, %v270_v26 }
  0xf3   :  { %1433 = vmatmul.mubr.msk.f32.vlgmr.msra.gmra.mrb[0].mxu1 %vm36_vm0, %v31_v25 }
  0xf4   :  { %1546 = vmatpush3.bf16.msra.mxu1 %v1545_v27  ;;  %v1455_v28 = vpop.f32.mrb[4].mxu0  ;;  %1446 = vmatprep.mubr.msk.f32.mxu1 %vm1625_vm1, %v1626_v20 }
  0xf5   :  { %v429_v29 = vpop.f32.mrb[5].mxu0  ;;  %1551 = vmatprep.subr.bf16.mxu1 %v1624_v19 }
  0xf6   :  { %v1552_v30 = vpack.c.bf16 %v1455_v28, %v429_v29 }
  0xf7   :  { %1447 = vmatmul.mubr.msk.f32.vlgmr.msra.gmra.mrb[2].mxu1 %vm36_vm0, %v31_v25 }
  0xf8   :  { %1553 = vmatpush3.bf16.msra.mxu1 %v1552_v30  ;;  %v1469_v31 = vpop.f32.mrb[6].mxu0  ;;  %1460 = vmatprep.mubr.msk.f32.mxu1 %vm1625_vm1, %v1626_v20 }
  0xf9   :  { %v588_v32 = vpop.f32.mrb[7].mxu0  ;;  %1558 = vmatprep.subr.bf16.mxu1 %v1624_v19 }
  0xfa   :  { %v1559_v33 = vpack.c.bf16 %v1469_v31, %v588_v32 }
  0xfb   :  { %1461 = vmatmul.mubr.msk.f32.vlgmr.msra.gmra.mrb[4].mxu1 %vm36_vm0, %v31_v25 }
  0xfc   :  { %1560 = vmatpush3.bf16.msra.mxu1 %v1559_v33  ;;  %v1483_v34 = vpop.f32.mrb[8].mxu0  ;;  %1474 = vmatprep.mubr.msk.f32.mxu1 %vm1625_vm1, %v1626_v20 }
  0xfd   :  { %v747_v35 = vpop.f32.mrb[9].mxu0  ;;  %1565 = vmatprep.subr.bf16.mxu1 %v1624_v19 }
  0xfe   :  { %v1566_v36 = vpack.c.bf16 %v1483_v34, %v747_v35 }
  0xff   :  { %1475 = vmatmul.mubr.msk.f32.vlgmr.msra.gmra.mrb[6].mxu1 %vm36_vm0, %v31_v25 }
 0x100   :  { %1567 = vmatpush3.bf16.msra.mxu1 %v1566_v36  ;;  %v1497_v37 = vpop.f32.mrb[10].mxu0  ;;  %1488 = vmatprep.mubr.msk.f32.mxu1 %vm1625_vm1, %v1626_v20 }
 0x101   :  { %v906_v38 = vpop.f32.mrb[11].mxu0  ;;  %1572 = vmatprep.subr.bf16.mxu1 %v1624_v19 }
 0x102   :  { %v1573_v39 = vpack.c.bf16 %v1497_v37, %v906_v38  ;;  %v1319_v37 = vlaneseq }
 0x103   :  { %1489 = vmatmul.mubr.msk.f32.vlgmr.msra.gmra.mrb[8].mxu1 %vm36_vm0, %v31_v25 }
 0x104   :  { %1574 = vmatpush3.bf16.msra.mxu1 %v1573_v39  ;;  %v1511_v40 = vpop.f32.mrb[12].mxu0  ;;  %1502 = vmatprep.mubr.msk.f32.mxu1 %vm1625_vm1, %v1626_v20  ;;  %v1320_v38 = vshrl.u32 %v1319_v37, 7  ;;  %v1322_v39 = vand.u32 127, %v1319_v37 }
 0x105   :  { %v1065_v41 = vpop.f32.mrb[13].mxu0  ;;  %1579 = vmatprep.subr.bf16.mxu1 %v1624_v19 }
 0x106   :  { %v1580_v42 = vpack.c.bf16 %v1511_v40, %v1065_v41  ;;  %vm1323_vm3 = vcmp.eq.s32.totalorder %v1320_v38, 0  ;;  %vm1324_vm4 = vcmp.eq.s32.totalorder %v1322_v39, 0 }
 0x107   :  { %1503 = vmatmul.mubr.msk.f32.vlgmr.msra.gmra.mrb[10].mxu1 %vm36_vm0, %v31_v25  ;;  %vm1325_vm5 = vmand %vm1323_vm3, %vm1324_vm4 }
 0x108   :  { %1581 = vmatpush3.bf16.msra.mxu1 %v1580_v42  ;;  %v1525_v43 = vpop.f32.mrb[14].mxu0  ;;  %1516 = vmatprep.mubr.msk.f32.mxu1 %vm1625_vm1, %v1626_v20 }
 0x109   :  { %v1224_v44 = vpop.f32.mrb[15].mxu0  ;;  %1586 = vmatprep.subr.bf16.mxu1 %v1624_v19 }
 0x10a   :  { %v1587_v45 = vpack.c.bf16 %v1525_v43, %v1224_v44 }
 0x10b   :  { %1517 = vmatmul.mubr.msk.f32.vlgmr.msra.gmra.mrb[12].mxu1 %vm36_vm0, %v31_v25 }
 0x10c   :  { %1588 = vmatpush3.bf16.msra.mxu1 %v1587_v45  ;;  %1530 = vmatprep.mubr.msk.f32.mxu1 %vm1625_vm1, %v1626_v20 }
 0x10f   :  { %1531 = vmatmul.mubr.msk.f32.vlgmr.msra.gmra.mrb[14].mxu1 %vm36_vm0, %v31_v25 }
 0x1c6   :  { %v187_v46 = vpop.f32.mrb[0].mxu1 }
 0x1c7   :  { %v1434_v48 = vpop.f32.mrb[1].mxu1  ;;  %v192_v50 = vsub.f32 %v191_v47, %v187_v46 }
 0x1c9   :  { %v193_v55 = vmul.f32 %v192_v50, %v192_v50 }
 0x1ca   :  { %v345_v51 = vpop.f32.mrb[2].mxu1 }
 0x1cb   :  { %v351_v52 = vsub.f32 %v1340_v49, %v345_v51  ;;  %v1448_v53 = vpop.f32.mrb[3].mxu1 }
 0x1cd   :  { %v352_v56 = vmul.f32 %v351_v52, %v351_v52 }
 0x1ce   :  { %v504_v57 = vpop.f32.mrb[4].mxu1 }
 0x1cf   :  { %v353_v58 = vadd.f32 %v352_v56, %v193_v55  ;;  %v510_v59 = vsub.f32 %v1344_v54, %v504_v57  ;;  %v1462_v60 = vpop.f32.mrb[5].mxu1 }
 0x1d1   :  { %v511_v62 = vmul.f32 %v510_v59, %v510_v59 }
 0x1d2   :  { %v663_v63 = vpop.f32.mrb[6].mxu1 }
 0x1d3   :  { %v512_v0 = vadd.f32 %v511_v62, %v353_v58  ;;  %v669_v1 = vsub.f32 %v1348_v61, %v663_v63  ;;  %v1476_v2 = vpop.f32.mrb[7].mxu1 }
 0x1d5   :  { %v670_v4 = vmul.f32 %v669_v1, %v669_v1 }
 0x1d6   :  { %v822_v5 = vpop.f32.mrb[8].mxu1 }
 0x1d7   :  { %v671_v6 = vadd.f32 %v670_v4, %v512_v0  ;;  %v828_v7 = vsub.f32 %v1352_v3, %v822_v5  ;;  %v1490_v8 = vpop.f32.mrb[9].mxu1 }
 0x1d9   :  { %v829_v10 = vmul.f32 %v828_v7, %v828_v7 }
 0x1da   :  { %v981_v11 = vpop.f32.mrb[10].mxu1 }
 0x1db   :  { %v830_v12 = vadd.f32 %v829_v10, %v671_v6  ;;  %v987_v13 = vsub.f32 %v1356_v9, %v981_v11  ;;  %v1504_v14 = vpop.f32.mrb[11].mxu1 }
 0x1dd   :  { %v988_v16 = vmul.f32 %v987_v13, %v987_v13 }
 0x1de   :  { %v1140_v17 = vpop.f32.mrb[12].mxu1 }
 0x1df   :  { %v989_v18 = vadd.f32 %v988_v16, %v830_v12  ;;  %v1146_v19 = vsub.f32 %v1360_v15, %v1140_v17  ;;  %v1518_v20 = vpop.f32.mrb[13].mxu1 }
 0x1e1   :  { %v1147_v22 = vmul.f32 %v1146_v19, %v1146_v19 }
 0x1e2   :  { %v1299_v23 = vpop.f32.mrb[14].mxu1 }
 0x1e3   :  { %v1148_v24 = vadd.f32 %v1147_v22, %v989_v18  ;;  %v1305_v25 = vsub.f32 %v1364_v21, %v1299_v23  ;;  %v1532_v26 = vpop.f32.mrb[15].mxu1 }
 0x1e5   :  { %v1306_v27 = vmul.f32 %v1305_v25, %v1305_v25 }
 0x1e7   :  { %v1307_v28 = vadd.f32 %v1306_v27, %v1148_v24 }
 0x1e9   :  { %v1309_v29 = vsel %vm1308_vm2, %v1307_v28, 0.0 }
 0x1ea   :  { %1310 = vadd.xlane.f32.xlu0 %v1309_v29 }
 0x277   :  { %v1311_v30 = vpop.xlane.xlu0 %1310 }
 0x278   :  { %v1312_v31 = vrot.slane %v1311_v30, 4 }
 0x27a   :  { %v1313_v32 = vadd.f32 %v1312_v31, %v1311_v30 }
 0x27c   :  { %v1314_v33 = vrot.slane %v1313_v32, 2 }
 0x27e   :  { %v1315_v34 = vadd.f32 %v1314_v33, %v1313_v32 }
 0x280   :  { %v1316_v35 = vrot.slane %v1315_v34, 1 }
 0x282   :  { %v1317_v36 = vadd.f32 %v1316_v35, %v1315_v34 }
 0x284   :  { %1589 = vpush %v1317_v36 }
 0x2b5   :  { %s1590_s1 = spop %1589 }
 0x2b6   :  { %v1326_v40 = vstv %s1590_s1 }
 0x2b7   :  { %v1327_v41 = vsel %vm1325_vm5, %v1326_v40, 0.0 }
 0x2b8   :  { %1328 = vst [vmem:[%s1736_s4] sm:$0xff] %v1327_v41 }
 0x2b9   :  { %1333 = vsyncpa [#allocation3], 1 }

</bundles_post_ra>
